<compile_context>
chip_gen: v7x
topology: tpu7x:2x2x1
jax: 0.10.0
libtpu: 0.0.40
codegen_flags: <defaults>
</compile_context>

<pallas_src>
import jax
import jax.numpy as jnp
from jax import lax
from jax.experimental import pallas as pl
from jax.experimental.pallas import tpu as pltpu


def _round_up(x: int, m: int) -> int:
    return ((x + m - 1) // m) * m


def _balanced_tile(dim: int, max_tile: int, align: int) -> int:
    """Largest aligned tile <= ~max_tile that spreads `dim` evenly over blocks.

    Caps padding at roughly one alignment group per block, e.g. dim=520,
    max=512 -> tile=264 (8 padded rows) instead of 512 (504 padded rows).
    """
    max_tile = max(align, max_tile)
    nblocks = max(1, -(-dim // max_tile))            # cdiv
    tile = _round_up(-(-dim // nblocks), align)
    return min(tile, _round_up(dim, align))


def _device_config(tile_caps=None):
    try:
        vmem_cap = int(pltpu.get_tpu_info().vmem_capacity_bytes)
    except Exception:
        vmem_cap = 64 * 1024 * 1024                  # conservative (v7x-sized)
    if vmem_cap >= 96 * 1024 * 1024:                 # v5e / v6e: 128 MiB per TC
        cfg = dict(tm_max=1024, tn_max=512, tk_max=1024,
                   vmem_limit=64 * 1024 * 1024)
    else:                                            # v7x: 64 MiB per TC
        cfg = dict(tm_max=512, tn_max=512, tk_max=512,
                   vmem_limit=40 * 1024 * 1024)
    if tile_caps is not None:
        cfg["tm_max"], cfg["tn_max"], cfg["tk_max"] = tile_caps
    return cfg


# --------------------------- kernels ---------------------------------------


def _linear_single_kernel(x_ref, w_ref, b_ref, o_ref):
    """Whole K and N in one step.

    x_ref: [tm, K]   activation tile (K = full, unpadded array dim)
    w_ref: [K,  Np]  transposed weight, grid-invariant -> DMA'd once, resident
    b_ref: [1,  Np]  bias, grid-invariant
    o_ref: [tm, Np]  output tile (lane-dense Np)
    """
    acc = jnp.dot(x_ref[...], w_ref[...], preferred_element_type=jnp.float32)
    o_ref[...] = (acc + b_ref[...].astype(jnp.float32)).astype(o_ref.dtype)


def _make_multi_kernel(k_total: int, tk: int):
    """General tiled kernel; handles a ragged last K block in-kernel."""
    ragged = (k_total % tk) != 0

    def kernel(x_ref, w_ref, b_ref, o_ref, acc_ref):
        k = pl.program_id(2)

        @pl.when(k == 0)
        def _init():
            acc_ref[...] = jnp.zeros_like(acc_ref)

        x = x_ref[...]
        w = w_ref[...]
        if ragged:
            # The last K block reads past the (unpadded) K edge of x / weight;
            # zero both operands there so no wrapper jnp.pad copy is needed.
            col = k * tk + lax.broadcasted_iota(jnp.int32, (1, tk), 1)
            row = k * tk + lax.broadcasted_iota(jnp.int32, (tk, 1), 0)
            x = jnp.where(col < k_total, x, 0)
            w = jnp.where(row < k_total, w, 0)

        acc_ref[...] += jnp.dot(x, w, preferred_element_type=jnp.float32)

        @pl.when(k == pl.num_programs(2) - 1)
        def _finalize():
            o_ref[...] = (acc_ref[...] + b_ref[...].astype(jnp.float32)
                          ).astype(o_ref.dtype)

    return kernel


# --------------------------- wrapper ----------------------------------------


def perception_predictor(x, weight, bias, dropout_rate: float = 0.0,
                         use_pallas=None, single_block=None, tile_caps=None):
    """dropout(p) + Linear: y = x @ weight.T + bias.

    x: [..., in_dim]; weight: [out_dim, in_dim] (PyTorch layout); bias: [out_dim].
    """
    if dropout_rate != 0.0:
        # TODO(synk): nonzero dropout would need pltpu.prng_seed/prng_random_bits masking.
        raise NotImplementedError("only dropout_rate == 0.0 is supported")

    orig_shape = x.shape
    K = orig_shape[-1]
    N, Kw = weight.shape
    assert Kw == K
    x2d = x.reshape(-1, K)
    M = x2d.shape[0]

    # Tiny problems: a fused XLA dot beats pallas launch + lane padding.
    if use_pallas is None:
        use_pallas = (M * N * K) >= (1 << 21)
    if not use_pallas:
        y = x @ weight.T.astype(x.dtype) + bias.astype(x.dtype)
        return y.astype(x.dtype)

    cfg = _device_config(tile_caps)
    vmem_budget = int(cfg["vmem_limit"] * 0.7)
    in_b = x.dtype.itemsize
    out_b = x.dtype.itemsize

    # Pre-transpose the (fixed) weight once to [K, N]: the kernel then feeds
    # the MXU a plain RHS with the contraction dim leading (no per-step vxpose).
    w_t = weight.T

    # ----- single-K-block path: whole weight resident in VMEM ---------------
    Np1 = _round_up(N, 128)                          # lane-dense output stores
    tm1 = _balanced_tile(M, cfg["tm_max"], 8)

    def single_vmem(tm):
        return (2 * tm * K * in_b        # x (double-buffered)
                + 2 * K * Np1 * in_b     # weight (resident; 2 buffers allocated)
                + 2 * Np1 * in_b         # bias
                + 2 * tm * Np1 * out_b   # output
                + tm * Np1 * 4)          # f32 dot result

    while tm1 > 8 and single_vmem(tm1) > vmem_budget:
        tm1 = max(8, _round_up(tm1 // 2, 8))

    if single_block is None:
        single_block = (Np1 <= 4096
                        and 2 * K * Np1 * in_b <= vmem_budget // 2
                        and single_vmem(tm1) <= vmem_budget)

    if single_block:
        w_p = jnp.pad(w_t, ((0, 0), (0, Np1 - N))) if Np1 != N else w_t
        b_p = (jnp.pad(bias, (0, Np1 - N)) if Np1 != N else bias).reshape(1, Np1)
        grid_m = pl.cdiv(M, tm1)

        out = pl.pallas_call(
            _linear_single_kernel,
            out_shape=jax.ShapeDtypeStruct((M, Np1), x.dtype),
            grid_spec=pltpu.PrefetchScalarGridSpec(
                num_scalar_prefetch=0,
                grid=(grid_m,),
                in_specs=[
                    pl.BlockSpec((tm1, K), lambda i: (i, 0)),    # x tile (K unpadded)
                    pl.BlockSpec((K, Np1), lambda i: (0, 0)),    # weight, resident
                    pl.BlockSpec((1, Np1), lambda i: (0, 0)),    # bias, resident
                ],
                out_specs=pl.BlockSpec((tm1, Np1), lambda i: (i, 0)),
            ),
            compiler_params=pltpu.CompilerParams(
                dimension_semantics=("parallel",),
                vmem_limit_bytes=cfg["vmem_limit"],
            ),
            cost_estimate=pl.CostEstimate(
                flops=2 * M * K * Np1,
                transcendentals=0,
                bytes_accessed=in_b * (M * K + K * Np1 + Np1) + out_b * M * Np1,
            ),
        )(x2d, w_p, b_p)
        out = out[:, :N] if Np1 != N else out
        return out.reshape(*orig_shape[:-1], N)

    # ----- general 3-D tiled path (large K and/or N) -------------------------
    tm = _balanced_tile(M, cfg["tm_max"], 8)
    tn = _balanced_tile(N, cfg["tn_max"], 128)
    tk = _balanced_tile(K, cfg["tk_max"], 128)
    gm, gn, gk = pl.cdiv(M, tm), pl.cdiv(N, tn), pl.cdiv(K, tk)
    Np = gn * tn

    w_p = jnp.pad(w_t, ((0, 0), (0, Np - N))) if Np != N else w_t
    b_p = (jnp.pad(bias, (0, Np - N)) if Np != N else bias).reshape(1, Np)

    out = pl.pallas_call(
        _make_multi_kernel(K, tk),
        out_shape=jax.ShapeDtypeStruct((M, Np), x.dtype),
        grid_spec=pltpu.PrefetchScalarGridSpec(
            num_scalar_prefetch=0,
            grid=(gm, gn, gk),
            in_specs=[
                pl.BlockSpec((tm, tk), lambda i, j, k: (i, k)),   # x tile
                pl.BlockSpec((tk, tn), lambda i, j, k: (k, j)),   # weight tile [K, N]
                pl.BlockSpec((1, tn), lambda i, j, k: (0, j)),    # bias tile
            ],
            out_specs=pl.BlockSpec((tm, tn), lambda i, j, k: (i, j)),
            scratch_shapes=[pltpu.VMEM((tm, tn), jnp.float32)],
        ),
        compiler_params=pltpu.CompilerParams(
            dimension_semantics=("parallel", "parallel", "arbitrary"),
            vmem_limit_bytes=cfg["vmem_limit"],
        ),
        cost_estimate=pl.CostEstimate(
            flops=2 * M * Np * gk * tk,
            transcendentals=0,
            bytes_accessed=in_b * (M * K * gn + K * Np * gm + Np) + out_b * M * Np,
        ),
    )(x2d, w_p, b_p)
    out = out[:, :N] if Np != N else out
    return out.reshape(*orig_shape[:-1], N)


# --------------------------- tests ------------------------------------------


if __name__ == "__main__":
    key = jax.random.PRNGKey(0)
    k1, k2, k3, k4, k5, k6, k7, k8, k9 = jax.random.split(key, 9)

    # 1) Module-natural small shapes; force the Pallas single-block path.
    batch, seq, input_dim, output_dim = 2, 8, 32, 16
    x = jax.random.normal(k1, (batch, seq, input_dim), dtype=jnp.float32)
    w = jax.random.normal(k2, (output_dim, input_dim), dtype=jnp.float32) * 0.05
    b = jax.random.normal(k3, (output_dim,), dtype=jnp.float32) * 0.01
    y = perception_predictor(x, w, b, use_pallas=True)
    jax.block_until_ready(y)
    y_ref = x @ w.T + b
    assert y.shape == (batch, seq, output_dim)
    assert jnp.allclose(y, y_ref, atol=1e-4, rtol=1e-4)

    # 2) Medium ragged shapes; auto-gated -> Pallas single-block path
    #    (balanced M tiling, x never padded).
    M2, K2, N2 = 520, 200, 130
    x2 = jax.random.normal(k4, (M2, K2), dtype=jnp.float32)
    w2 = jax.random.normal(k5, (N2, K2), dtype=jnp.float32) * 0.05
    b2 = jax.random.normal(k6, (N2,), dtype=jnp.float32) * 0.01
    y2 = perception_predictor(x2, w2, b2)
    jax.block_until_ready(y2)
    y2_ref = jnp.dot(x2, w2.T, precision=lax.Precision.HIGHEST) + b2
    assert y2.shape == (M2, N2)
    assert jnp.allclose(y2, y2_ref, atol=1e-2, rtol=1e-2)

    # 3) Force the general 3-D path (multi-K accumulation + ragged-K masking).
    M3, K3, N3 = 300, 260, 200
    x3 = jax.random.normal(k7, (M3, K3), dtype=jnp.float32)
    w3 = jax.random.normal(k8, (N3, K3), dtype=jnp.float32) * 0.05
    b3 = jax.random.normal(k9, (N3,), dtype=jnp.float32) * 0.01
    y3 = perception_predictor(x3, w3, b3, use_pallas=True, single_block=False,
                              tile_caps=(128, 128, 128))
    jax.block_until_ready(y3)
    y3_ref = jnp.dot(x3, w3.T, precision=lax.Precision.HIGHEST) + b3
    assert y3.shape == (M3, N3)
    assert jnp.allclose(y3, y3_ref, atol=1e-2, rtol=1e-2)

    print("KERNEL_OK")
</pallas_src>

<mosaic_0001>
module attributes {stable_mosaic.version = 11 : i64} {
  func.func @_linear_single_kernel(%arg0: i32, %arg1: memref<16x32xf32, #tpu.memory_space<vmem>>, %arg2: memref<32x128xf32, #tpu.memory_space<vmem>>, %arg3: memref<1x128xf32, #tpu.memory_space<vmem>>, %arg4: memref<16x128xf32, #tpu.memory_space<vmem>>) attributes {dimension_semantics = [#tpu.dimension_semantics<parallel>], iteration_bounds = array<i64: 1>, scalar_prefetch = 0 : i64, scratch_operands = 0 : i64, tpu.core_type = #tpu.core_type<tc>, window_params = [{transform_indices = @transform_0, window_bounds = array<i64: 16, 32>}, {pipeline_mode = #tpu.pipeline_mode<synchronous>, transform_indices = @transform_1, window_bounds = array<i64: 32, 128>}, {pipeline_mode = #tpu.pipeline_mode<synchronous>, transform_indices = @transform_2, window_bounds = array<i64: 1, 128>}, {transform_indices = @transform_3, window_bounds = array<i64: 16, 128>}]} {
    %c0 = arith.constant 0 : index
    %c0_0 = arith.constant 0 : index
    %0 = vector.load %arg1[%c0, %c0_0] : memref<16x32xf32, #tpu.memory_space<vmem>>, vector<16x32xf32>
    %c0_1 = arith.constant 0 : index
    %c0_2 = arith.constant 0 : index
    %1 = vector.load %arg2[%c0_1, %c0_2] : memref<32x128xf32, #tpu.memory_space<vmem>>, vector<32x128xf32>
    %cst = arith.constant dense<0.000000e+00> : vector<16x128xf32>
    %2 = tpu.matmul %0, %1, %cst {dimension_numbers = #tpu.dot_dimension_numbers<[1], [0], [0], [1], [0, 0, 1, 1], [], []>} : vector<16x32xf32>, vector<32x128xf32>, vector<16x128xf32> -> vector<16x128xf32>
    %c0_3 = arith.constant 0 : index
    %c0_4 = arith.constant 0 : index
    %3 = vector.load %arg3[%c0_3, %c0_4] : memref<1x128xf32, #tpu.memory_space<vmem>>, vector<1x128xf32>
    %4 = vector.broadcast %3 : vector<1x128xf32> to vector<16x128xf32>
    %5 = arith.addf %2, %4 : vector<16x128xf32>
    %c0_5 = arith.constant 0 : index
    %c0_6 = arith.constant 0 : index
    %6 = vector.load %arg4[%c0_5, %c0_6] : memref<16x128xf32, #tpu.memory_space<vmem>>, vector<16x128xf32>
    tpu.vector_store %arg4[%c0_5, %c0_6], %5 {strides = array<i32>} : memref<16x128xf32, #tpu.memory_space<vmem>>, vector<16x128xf32>,
    return
  }
  func.func @transform_0(%arg0: i32) -> (i32, i32) {
    %c0_i32 = arith.constant 0 : i32
    %c0_i32_0 = arith.constant 0 : i32
    return %arg0, %c0_i32 : i32, i32
  }
  func.func @transform_1(%arg0: i32) -> (i32, i32) {
    %c0_i32 = arith.constant 0 : i32
    %c0_i32_0 = arith.constant 0 : i32
    %c0_i32_1 = arith.constant 0 : i32
    return %c0_i32, %c0_i32_0 : i32, i32
  }
  func.func @transform_2(%arg0: i32) -> (i32, i32) {
    %c0_i32 = arith.constant 0 : i32
    %c0_i32_0 = arith.constant 0 : i32
    %c0_i32_1 = arith.constant 0 : i32
    return %c0_i32, %c0_i32_0 : i32, i32
  }
  func.func @transform_3(%arg0: i32) -> (i32, i32) {
    %c0_i32 = arith.constant 0 : i32
    %c0_i32_0 = arith.constant 0 : i32
    return %arg0, %c0_i32 : i32, i32
  }
}

</mosaic_0001>

<bundles_post_ra>
// kernel: tpu_custom_call.1
= control target key start
LH: loop header
LB: loop body
LE: loop exit
PB: predicated region body
PF: predicated region fallthrough
CT: control target
= control target key end

     0   :  { %8 = vsyncpa [#allocation3], 0  ;;  %s336_s0 = inlined_call_operand.hbm [shape: f32[16,32], index: 0, kind: input, shape index: {}]   ;;  %s337_s1 = inlined_call_operand.hbm [shape: f32[32,128], index: 1, kind: input, shape index: {}]   ;;  %s338_s2 = inlined_call_operand.vmem [shape: f32[1,128], index: 2, kind: input, shape index: {}]   ;;  %s339_s3 = inlined_call_operand.hbm [shape: f32[16,128], index: 3, kind: output, shape index: {}]  }
   0x1   :  { %9 = vsyncpa [#allocation6], 0 }
   0x2   :  { %10 = vsyncpa [#allocation4], 0  ;;  %s263_s12 = smov [#allocation2]   ;;  %s191_s16 = scalar_lea.hbm %s336_s0, 256 }
   0x3   :  { %s16_s13 = sshll.u32 %s263_s12, 4  ;;  %p192_p0 = scmp.ne.s32.totalorder %s336_s0, %s191_s16  ;;  %s17_s13 = int_to_ptr.vmem [resolvable:$true] %s16_s13 }
   0x4   :  { %p195_p1 = scmp.lt.u32.totalorder %s191_s16, %s336_s0 }
   0x6   :  { %p197_p2 = pnand %p195_p1, %p192_p0 }
   0x8   :  { %200 = shalt.err (!%p197_p2)
}
   0x9   :  { %s201_s21 = scalar_lea.vmem %s17_s13, 256  ;;  %p206_p4 = scmp.lt.s32.totalorder %s17_s13, %s17_s13 }
   0xa   :  { %p202_p3 = scmp.ne.s32.totalorder %s17_s13, %s201_s21  ;;  %p207_p5 = scmp.lt.s32.totalorder %s201_s21, %s201_s21 }
   0xc   :  { %p208_p6 = por %p207_p5, %p206_p4 }
   0xe   :  { %p209_p7 = pnand %p208_p6, %p202_p3 }
  0x10   :  { %212 = shalt.err (!%p209_p7)
}
  0x11   :  { %s264_s22 = smov 128   ;;  %s265_s23 = smov 8  }
  0x12   :  { %22 = dma.hbm_to_vmem [thread:$0]  %s336_s0, 256, %s17_s13, [#allocation3], %s264_s22, %s264_s22, %s265_s23  }
  0x13   :  { %s266_s26 = smov [#allocation5]   ;;  %s213_s30 = scalar_lea.hbm %s337_s1, 512 }
  0x14   :  { %s28_s27 = sshll.u32 %s266_s26, 4  ;;  %p214_p8 = scmp.ne.s32.totalorder %s337_s1, %s213_s30  ;;  %s29_s27 = int_to_ptr.vmem [resolvable:$true] %s28_s27 }
  0x15   :  { %p217_p9 = scmp.lt.u32.totalorder %s213_s30, %s337_s1 }
  0x17   :  { %p219_p10 = pnand %p217_p9, %p214_p8 }
  0x19   :  { %222 = shalt.err (!%p219_p10)
}
  0x1a   :  { %s223_s8 = scalar_lea.vmem %s29_s27, 512  ;;  %p228_p12 = scmp.lt.s32.totalorder %s29_s27, %s29_s27 }
  0x1b   :  { %p224_p11 = scmp.ne.s32.totalorder %s29_s27, %s223_s8  ;;  %p229_p13 = scmp.lt.s32.totalorder %s223_s8, %s223_s8 }
  0x1d   :  { %p230_p0 = por %p229_p13, %p228_p12 }
  0x1f   :  { %p231_p1 = pnand %p230_p0, %p224_p11 }
  0x21   :  { %234 = shalt.err (!%p231_p1)
}
  0x22   :  { %34 = dma.hbm_to_vmem [thread:$0]  %s337_s1, 512, %s29_s27, [#allocation6], %s264_s22, %s264_s22, %s265_s23  }
  0x23   :  { %257 = dma.done.wait [#allocation3], 256  }
  0x24   :  { %258 = vsyncadd [#allocation3], 4294967040 }
  0x25   :  { %259 = dma.done.wait [#allocation6], 512  }
  0x26   :  { %260 = vsyncadd [#allocation6], 4294966784  ;;  %vm56_vm0 = vcmask 261120   ;;  %v45_v0 = vld [vmem:[#allocation5] sm:$0xff]  ;;  %v46_v1 = vld [vmem:[#allocation5 + $0x8] sm:$0xff]  ;;  %s267_s11 = smov [#allocation7]  }
  0x27   :  { %v47_v2 = vld [vmem:[#allocation5 + $0x10] sm:$0xff]  ;;  %v178_v3 = vpack.c.bf16 %v46_v1, %v45_v0  ;;  %v48_v4 = vld [vmem:[#allocation5 + $0x18] sm:$0xff]  ;;  %s145_s12 = sshll.u32 %s267_s11, 4  ;;  %s146_s12 = int_to_ptr.vmem [resolvable:$true] %s145_s12 }
  0x28   :  { %v43_v5 = vld [vmem:[#allocation2] sm:$0xff]  ;;  %v182_v6 = vpack.c.bf16 %v48_v4, %v47_v2  ;;  %v44_v7 = vld [vmem:[#allocation2 + $0x8] sm:$0xff]  ;;  %s235_s13 = scalar_lea.vmem %s146_s12, 256  ;;  %p240_p3 = scmp.lt.s32.totalorder %s146_s12, %s146_s12 }
  0x29   :  { %175 = vmatprep.mubr.msk.f32.mxu0 %vm56_vm0, %v43_v5  ;;  %179 = vmatprep.subr.bf16.mxu0 %v178_v3  ;;  %v158_v8 = vld [vmem:[%s338_s2] ss:$0 sm:$0xff]  ;;  %p236_p2 = scmp.ne.s32.totalorder %s146_s12, %s235_s13  ;;  %p241_p4 = scmp.lt.s32.totalorder %s235_s13, %s235_s13 }
  0x2a   :  { %181 = vmatpush3.bf16.msra.mxu0 %v178_v3 }
  0x2b   :  { %183 = vmatprep.subr.bf16.mxu0 %v182_v6  ;;  %p242_p5 = por %p241_p4, %p240_p3 }
  0x2d   :  { %p243_p6 = pnand %p242_p5, %p236_p2 }
  0x2e   :  { %185 = vmatpush3.bf16.msra.mxu0 %v182_v6 }
  0x31   :  { %176 = vmatmul.mubr.msk.f32.vlgmr.msra.gmra.mrb[0].mxu0 %vm56_vm0, %v44_v7 }
 0x104   :  { %v177_v9 = vpop.f32.mrb[0].mxu0 }
 0x105   :  { %v135_v10 = vadd.f32 %v177_v9, %v158_v8  ;;  %v129_v11 = vpop.f32.mrb[1].mxu0 }
 0x106   :  { %v130_v12 = vadd.f32 %v158_v8, %v129_v11 }
 0x107   :  { %139 = vst [vmem:[#allocation7 + $0x8] sm:$0xff] %v135_v10 }
 0x108   :  { %138 = vst [vmem:[#allocation7] sm:$0xff] %v130_v12 }
 0x109   :  { %246 = shalt.err (!%p243_p6)
}
 0x10a   :  { %s247_s2 = scalar_lea.hbm %s339_s3, 256 }
 0x10b   :  { %p248_p7 = scmp.ne.s32.totalorder %s339_s3, %s247_s2  ;;  %p251_p8 = scmp.lt.u32.totalorder %s247_s2, %s339_s3 }
 0x10d   :  { %p253_p9 = pnand %p251_p8, %p248_p7 }
 0x10f   :  { %256 = shalt.err (!%p253_p9)
}
 0x110   :  { %151 = dma.vmem_to_hbm [thread:$0]  %s146_s12, 256, %s339_s3, [#allocation4], %s264_s22, %s264_s22, %s265_s23  }
 0x111   :  { %261 = dma.done.wait [#allocation4], 256  }
 0x112   :  { %262 = vsyncadd [#allocation4], 4294967040 }
 0x113   :  { %155 = vsyncpa [#allocation3], 1 }
 0x114   :  { %156 = vsyncpa [#allocation6], 1 }
 0x115   :  { %157 = vsyncpa [#allocation4], 1 }

</bundles_post_ra>
